<compile_context>
chip_gen: v7x
topology: tpu7x:2x2x1
jax: 0.10.0
libtpu: 0.0.40
codegen_flags: <defaults>
</compile_context>

<pallas_src>
import jax
import jax.numpy as jnp
from jax.experimental import pallas as pl
from jax.experimental.pallas import tpu as pltpu

_EPS = 1e-5


# ----------------------------------------------------------------------------
# Kernel body
# ----------------------------------------------------------------------------
def _ln_channel_kernel(x_ref, w_ref, b_ref, o_ref):
    # x_ref: (1, C, T) -- normalize over axis=1 (channels, sublane axis).
    # w_ref/b_ref: (1, C, 1).
    x = x_ref[...].astype(jnp.float32)
    inv_c = jnp.float32(1.0 / x.shape[1])

    # Two-pass (subtract-mean) variance in fp32: avoids the E[x^2] - mu^2
    # cancellation when |mean| >> std, matching torch.var(unbiased=False).
    mu = jnp.sum(x, axis=1, keepdims=True) * inv_c        # (1, 1, T)
    xc = x - mu
    var = jnp.sum(xc * xc, axis=1, keepdims=True) * inv_c  # biased variance
    inv = jax.lax.rsqrt(var + _EPS)                         # EUP (free slot)

    w = w_ref[...].astype(jnp.float32)                      # (1, C, 1)
    b = b_ref[...].astype(jnp.float32)
    o_ref[...] = (xc * (inv * w) + b).astype(o_ref.dtype)


# ----------------------------------------------------------------------------
# Tile selection
# ----------------------------------------------------------------------------
def _round_up(x, m):
    return ((x + m - 1) // m) * m


def _round_down_min(x, m):
    return max(m, (x // m) * m)


def _choose_spatial_tile(hw, c, itemsize, batch,
                         io_budget_bytes=8 * 1024 * 1024,
                         min_block_bytes=512 * 1024,
                         target_steps=8):
    """Pick spatial tile T (multiple of 128).

    Goals (memory-bound kernel):
      * >= ~target_steps total grid steps so the BlockSpec pipeline has DMAs to
        overlap and both v7x TensorCores get a balanced share,
      * each (1, C, T) block >= ~512 KiB (HBM-roofline floor),
      * per-step VMEM (double-buffered in+out + fp32 working copies) under a
        budget that is safe on v5e (16 MiB scoped default), v6e and v7x,
      * prefer a T that divides HW exactly (no padding pass over HBM).
    """
    hw128 = _round_up(hw, 128)

    # Double-buffered in + out (4 * c*T*itemsize) plus ~3 fp32 temps of the
    # block inside the body (x, x - mu, y) = 12 * c*T bytes.
    bytes_per_t = c * (4 * itemsize + 12)
    t_budget = _round_down_min(io_budget_bytes // max(bytes_per_t, 1), 128)

    # Steps along the HW axis so batch * hw_steps >= target_steps.
    hw_steps = max(1, -(-target_steps // max(batch, 1)))
    t_steps = _round_down_min(hw128 // hw_steps, 128)

    # ...but never shrink a block below ~min_block_bytes (bandwidth floor).
    t_min_bw = _round_up(-(-min_block_bytes // (c * itemsize)), 128)

    t = max(t_steps, t_min_bw)
    t = min(t, t_budget, hw128)
    t = max(t, 128)

    # Prefer an exact divisor of HW (avoids a jnp.pad copy over HBM).
    if hw % 128 == 0:
        for cand in range(t, 127, -128):
            if hw % cand == 0:
                return cand
    return t


# ----------------------------------------------------------------------------
# Wrappers
# ----------------------------------------------------------------------------
def _jnp_nchw(x, weight, bias):
    """Plain-XLA path for tiny feature maps (launch/step overhead dominates)."""
    xf = x.astype(jnp.float32)
    mu = jnp.mean(xf, axis=1, keepdims=True)
    var = jnp.mean((xf - mu) ** 2, axis=1, keepdims=True)
    w = weight.astype(jnp.float32).reshape(1, -1, 1, 1)
    b = bias.astype(jnp.float32).reshape(1, -1, 1, 1)
    return ((xf - mu) * jax.lax.rsqrt(var + _EPS) * w + b).astype(x.dtype)


def with_bias_layernorm_nchw(x_nchw, weight, bias, *,
                             force_pallas=False, donate_input=False):
    """LayerNorm over the channel axis of an NCHW tensor.

    Equivalent to Diff-Mamba's to_3d(x) -> WithBias_LayerNorm(C) -> to_4d(...),
    without host-side transposes (layout is folded into the BlockSpec).
    """
    B, C, H, W = x_nchw.shape
    HW = H * W

    # Tiny maps: a single fused XLA LN beats the Pallas machinery.
    if not force_pallas and (HW < 128 or C * HW * x_nchw.dtype.itemsize < 256 * 1024):
        return _jnp_nchw(x_nchw, weight, bias)

    T = _choose_spatial_tile(HW, C, x_nchw.dtype.itemsize, B)
    HW_pad = _round_up(HW, T)

    x3 = x_nchw.reshape(B, C, HW)          # contiguous reshape: no data movement
    if HW_pad != HW:
        # Lane-pad the spatial axis so every block is full (unmasked vst);
        # padded columns are independent lanes and are sliced off afterwards.
        x3 = jnp.pad(x3, ((0, 0), (0, 0), (0, HW_pad - HW)))
    w3 = weight.reshape(1, C, 1)
    b3 = bias.reshape(1, C, 1)

    grid = (B, HW_pad // T)
    io_aliases = {0: 0} if (donate_input and HW_pad == HW) else {}

    y3 = pl.pallas_call(
        _ln_channel_kernel,
        out_shape=jax.ShapeDtypeStruct((B, C, HW_pad), x3.dtype),
        grid_spec=pltpu.PrefetchScalarGridSpec(
            num_scalar_prefetch=0,
            grid=grid,
            in_specs=[
                pl.BlockSpec((1, C, T), lambda b, t: (b, 0, t)),
                pl.BlockSpec((1, C, 1), lambda b, t: (0, 0, 0)),
                pl.BlockSpec((1, C, 1), lambda b, t: (0, 0, 0)),
            ],
            out_specs=pl.BlockSpec((1, C, T), lambda b, t: (b, 0, t)),
        ),
        compiler_params=pltpu.CompilerParams(
            dimension_semantics=("parallel", "parallel"),
            vmem_limit_bytes=32 * 1024 * 1024,   # explicit; safe on v5e/v6e/v7x
        ),
        input_output_aliases=io_aliases,
    )(x3, w3, b3)

    if HW_pad != HW:
        y3 = y3[:, :, :HW]
    return y3.reshape(B, C, H, W)


def _reference_nchw(x_nchw, weight, bias):
    x = jnp.transpose(x_nchw, (0, 2, 3, 1)).astype(jnp.float32)  # (B,H,W,C)
    mu = jnp.mean(x, axis=-1, keepdims=True)
    var = jnp.mean((x - mu) ** 2, axis=-1, keepdims=True)
    y = (x - mu) / jnp.sqrt(var + _EPS) * weight.astype(jnp.float32) \
        + bias.astype(jnp.float32)
    return jnp.transpose(y, (0, 3, 1, 2))


# ----------------------------------------------------------------------------
# Self-test
# ----------------------------------------------------------------------------
if __name__ == "__main__":
    kx, kw, kb, kx2, kx3 = jax.random.split(jax.random.PRNGKey(0), 5)

    # 1) Small NCHW map, f32, trivial affine (exactly the module's __init__).
    B, C, H, W = 2, 32, 16, 16
    x = jax.random.normal(kx, (B, C, H, W), dtype=jnp.float32)
    weight = jnp.ones((C,), dtype=jnp.float32)   # nn.Parameter(torch.ones(C))
    bias = jnp.zeros((C,), dtype=jnp.float32)    # nn.Parameter(torch.zeros(C))

    y = jax.block_until_ready(
        with_bias_layernorm_nchw(x, weight, bias, force_pallas=True))
    y_ref = _reference_nchw(x, weight, bias)
    assert y.shape == (B, C, H, W)
    assert float(jnp.max(jnp.abs(y - y_ref))) < 1e-4, "pallas path mismatch"

    # Default dispatch (tiny-map jnp fallback) must agree too.
    y_d = jax.block_until_ready(with_bias_layernorm_nchw(x, weight, bias))
    assert float(jnp.max(jnp.abs(y_d - y_ref))) < 1e-4, "fallback path mismatch"

    # 2) Non-trivial affine + input_output_aliases path.
    weight2 = jax.random.normal(kw, (C,), dtype=jnp.float32)
    bias2 = jax.random.normal(kb, (C,), dtype=jnp.float32)
    y2 = jax.block_until_ready(
        with_bias_layernorm_nchw(x, weight2, bias2,
                                 force_pallas=True, donate_input=True))
    assert float(jnp.max(jnp.abs(y2 - _reference_nchw(x, weight2, bias2)))) < 1e-4

    # 3) Non-128-divisible H*W (exercises the lane-padding path), shifted input
    #    (stresses the variance formulation).
    xp = jax.random.normal(kx2, (1, 48, 20, 20), dtype=jnp.float32) * 2.0 + 3.0
    wp = jax.random.normal(kw, (48,), dtype=jnp.float32)
    bp = jax.random.normal(kb, (48,), dtype=jnp.float32)
    yp = jax.block_until_ready(
        with_bias_layernorm_nchw(xp, wp, bp, force_pallas=True))
    assert float(jnp.max(jnp.abs(yp - _reference_nchw(xp, wp, bp)))) < 1e-4

    # 4) bf16 I/O (fp32 math inside).
    xb = jax.random.normal(kx3, (2, 64, 16, 16), dtype=jnp.bfloat16)
    wb = jnp.ones((64,), dtype=jnp.bfloat16)
    bb = jnp.zeros((64,), dtype=jnp.bfloat16)
    yb = jax.block_until_ready(
        with_bias_layernorm_nchw(xb, wb, bb, force_pallas=True))
    yb_ref = _reference_nchw(xb.astype(jnp.float32), wb.astype(jnp.float32),
                             bb.astype(jnp.float32))
    assert float(jnp.max(jnp.abs(yb.astype(jnp.float32) - yb_ref))) < 5e-2

    print("KERNEL_OK")
</pallas_src>

<mosaic_0001>
module attributes {stable_mosaic.version = 11 : i64} {
  func.func @_ln_channel_kernel(%arg0: i32, %arg1: i32, %arg2: memref<1x32x256xf32, #tpu.memory_space<vmem>>, %arg3: memref<1x32x1xf32, #tpu.memory_space<vmem>>, %arg4: memref<1x32x1xf32, #tpu.memory_space<vmem>>, %arg5: memref<1x32x256xf32, #tpu.memory_space<vmem>>) attributes {dimension_semantics = [#tpu.dimension_semantics<parallel>, #tpu.dimension_semantics<parallel>], iteration_bounds = array<i64: 2, 1>, scalar_prefetch = 0 : i64, scratch_operands = 0 : i64, tpu.core_type = #tpu.core_type<tc>, window_params = [{transform_indices = @transform_0, window_bounds = array<i64: 1, 32, 256>}, {pipeline_mode = #tpu.pipeline_mode<synchronous>, transform_indices = @transform_1, window_bounds = array<i64: 1, 32, 1>}, {pipeline_mode = #tpu.pipeline_mode<synchronous>, transform_indices = @transform_2, window_bounds = array<i64: 1, 32, 1>}, {transform_indices = @transform_3, window_bounds = array<i64: 1, 32, 256>}]} {
    %c0 = arith.constant 0 : index
    %c0_0 = arith.constant 0 : index
    %c0_1 = arith.constant 0 : index
    %0 = vector.load %arg2[%c0, %c0_0, %c0_1] : memref<1x32x256xf32, #tpu.memory_space<vmem>>, vector<1x32x256xf32>
    %cst = arith.constant dense<0.000000e+00> : vector<1x256xf32>
    %1 = vector.multi_reduction <add>, %0, %cst [1] : vector<1x32x256xf32> to vector<1x256xf32>
    %2 = vector.shape_cast %1 : vector<1x256xf32> to vector<1x1x256xf32>
    %cst_2 = arith.constant 3.125000e-02 : f32
    %3 = vector.broadcast %cst_2 : f32 to vector<1x1x256xf32>
    %4 = arith.mulf %2, %3 : vector<1x1x256xf32>
    %5 = vector.broadcast %4 : vector<1x1x256xf32> to vector<1x32x256xf32>
    %6 = arith.subf %0, %5 : vector<1x32x256xf32>
    %7 = arith.mulf %6, %6 : vector<1x32x256xf32>
    %cst_3 = arith.constant dense<0.000000e+00> : vector<1x256xf32>
    %8 = vector.multi_reduction <add>, %7, %cst_3 [1] : vector<1x32x256xf32> to vector<1x256xf32>
    %9 = vector.shape_cast %8 : vector<1x256xf32> to vector<1x1x256xf32>
    %cst_4 = arith.constant 3.125000e-02 : f32
    %10 = vector.broadcast %cst_4 : f32 to vector<1x1x256xf32>
    %11 = arith.mulf %9, %10 : vector<1x1x256xf32>
    %cst_5 = arith.constant 9.99999974E-6 : f32
    %12 = vector.broadcast %cst_5 : f32 to vector<1x1x256xf32>
    %13 = arith.addf %11, %12 : vector<1x1x256xf32>
    %14 = math.rsqrt %13 : vector<1x1x256xf32>
    %c0_6 = arith.constant 0 : index
    %c0_7 = arith.constant 0 : index
    %c0_8 = arith.constant 0 : index
    %15 = vector.load %arg3[%c0_6, %c0_7, %c0_8] : memref<1x32x1xf32, #tpu.memory_space<vmem>>, vector<1x32x1xf32>
    %c0_9 = arith.constant 0 : index
    %c0_10 = arith.constant 0 : index
    %c0_11 = arith.constant 0 : index
    %16 = vector.load %arg4[%c0_9, %c0_10, %c0_11] : memref<1x32x1xf32, #tpu.memory_space<vmem>>, vector<1x32x1xf32>
    %17 = vector.broadcast %14 : vector<1x1x256xf32> to vector<1x32x256xf32>
    %18 = vector.broadcast %15 : vector<1x32x1xf32> to vector<1x32x256xf32>
    %19 = arith.mulf %17, %18 : vector<1x32x256xf32>
    %20 = arith.mulf %6, %19 : vector<1x32x256xf32>
    %21 = vector.broadcast %16 : vector<1x32x1xf32> to vector<1x32x256xf32>
    %22 = arith.addf %20, %21 : vector<1x32x256xf32>
    %c0_12 = arith.constant 0 : index
    %c0_13 = arith.constant 0 : index
    %c0_14 = arith.constant 0 : index
    %23 = vector.load %arg5[%c0_12, %c0_13, %c0_14] : memref<1x32x256xf32, #tpu.memory_space<vmem>>, vector<1x32x256xf32>
    tpu.vector_store %arg5[%c0_12, %c0_13, %c0_14], %22 {strides = array<i32>} : memref<1x32x256xf32, #tpu.memory_space<vmem>>, vector<1x32x256xf32>,
    return
  }
  func.func @transform_0(%arg0: i32, %arg1: i32) -> (i32, i32, i32) {
    %c0_i32 = arith.constant 0 : i32
    %c0_i32_0 = arith.constant 0 : i32
    return %arg0, %c0_i32, %arg1 : i32, i32, i32
  }
  func.func @transform_1(%arg0: i32, %arg1: i32) -> (i32, i32, i32) {
    %c0_i32 = arith.constant 0 : i32
    %c0_i32_0 = arith.constant 0 : i32
    %c0_i32_1 = arith.constant 0 : i32
    %c0_i32_2 = arith.constant 0 : i32
    return %c0_i32, %c0_i32_0, %c0_i32_1 : i32, i32, i32
  }
  func.func @transform_2(%arg0: i32, %arg1: i32) -> (i32, i32, i32) {
    %c0_i32 = arith.constant 0 : i32
    %c0_i32_0 = arith.constant 0 : i32
    %c0_i32_1 = arith.constant 0 : i32
    %c0_i32_2 = arith.constant 0 : i32
    return %c0_i32, %c0_i32_0, %c0_i32_1 : i32, i32, i32
  }
  func.func @transform_3(%arg0: i32, %arg1: i32) -> (i32, i32, i32) {
    %c0_i32 = arith.constant 0 : i32
    %c0_i32_0 = arith.constant 0 : i32
    return %arg0, %c0_i32, %arg1 : i32, i32, i32
  }
}

</mosaic_0001>

<bundles_post_ra>
// kernel: tpu_custom_call.1
= control target key start
LH: loop header
LB: loop body
LE: loop exit
PB: predicated region body
PF: predicated region fallthrough
CT: control target
= control target key end

     0   :  { %8 = vsyncpa [#allocation3], 0  ;;  %s914_s0 = inlined_call_operand.hbm [shape: f32[2,32,256], index: 0, kind: input, shape index: {}]   ;;  %s915_s1 = inlined_call_operand.vmem [shape: f32[1,32,1], index: 1, kind: input, shape index: {}]   ;;  %s916_s2 = inlined_call_operand.vmem [shape: f32[1,32,1], index: 2, kind: input, shape index: {}]   ;;  %s917_s3 = inlined_call_operand.hbm [shape: f32[2,32,256], index: 3, kind: output, shape index: {}]  }
   0x1   :  { %10 = vsyncpa [#allocation3 + $0x1], 0 }
   0x2   :  { %11 = vsyncpa [#allocation4], 0 }
   0x3   :  { %13 = vsyncpa [#allocation4 + $0x1], 0  ;;  %s691_s12 = smov 0   ;;  %s693_s13 = smov 0  }
   0x4   :  { %s695_s14 = smov 0   ;;  %s697_s15 = smov 0  }
   0x5   :  { %s699_s16 = smov 0   ;;  %s701_s17 = smov 0  }
   0x6 LB: > { %s460_s18 = sadd.s32 4294967295, %s662_s17   ;;  %s461_s19 = sadd.s32 4294967294, %s662_s17   ;;  %s662_s17 = sphi %s701_s17, %s19_s17   ;;  %s658_s16 = sphi %s699_s16, %s932_s16   ;;  %s654_s15 = sphi %s697_s15, %s931_s15   ;;  %s650_s14 = sphi %s695_s14, %s930_s14   ;;  %s646_s13 = sphi %s693_s13, %s929_s13   ;;  %s642_s12 = sphi %s691_s12, %s928_s12  }
   0x7   : > { %s31_s20 = sadd.s32 1, %s658_s16  ;;  %s40_s21 = sadd.s32 1, %s650_s14 }
   0x8   : > { %p33_p0 = scmp.ge.s32.totalorder %s31_s20, 2  ;;  %p47_p1 = scmp.ne.s32.totalorder %s650_s14, %s646_s13 }
   0x9   : > { %p48_p2 = scmp.eq.s32.totalorder %s662_s17, 0  ;;  %p53_p3 = scmp.ne.s32.totalorder %s646_s13, %s642_s12 }
   0xa   : > { %s934_s20 = smov (%p33_p0, %s31_s20), 0  ;;  %p54_p5 = scmp.eq.s32.totalorder %s460_s18, 0 }
   0xb   : > { %p732_p4 = por %p48_p2, %p47_p1  ;;  %s35_s23 = ssub.s32 %s658_s16, %s934_s20 }
   0xc   : > { %p121_p6 = scmp.eq.s32.totalorder %s460_s18, 1  ;;  %p38_p7 = scmp.eq.s32.totalorder %s35_s23, 0 }
   0xd   : > { %p738_p8 = por %p54_p5, %p53_p3  ;;  %p127_p10 = scmp.eq.s32.totalorder %s461_s19, 1 }
   0xe   : > { %p742_p9 = por %p121_p6, %p47_p1  ;;  %p489_p13 = scmp.lt.s32.totalorder %s662_s17, 2 }
   0xf   : > { %s747_s26 = scalar_select %p38_p7, %s650_s14, %s40_s21  }
  0x10   : > { %s921_s25 = scalar_select %p742_p9, 1, 0 }
  0x11   : > { %p749_p11 = por %p127_p10, %p53_p3  ;;  %s153_s28 = sand.u32 1, %s650_s14  }
  0x12   : > { %s464_s29 = sshll.u32 %s153_s28, 6  ;;  %s475_s30 = sshll.u32 %s658_s16, 10 }
  0x13   : > { %s922_s27 = scalar_select %p749_p11, 1, 0 }
  0x14   : > { %s760_s6 = scalar_lea.hbm %s914_s0, %s475_s30  ;;  %s157_s7 = scalar_lea.vmem [#allocation2], %s464_s29 }
  0x15   : > { %s166_s8 = sshll.u32 %s157_s7, 4  ;;  %p766_p0 = pnand %p489_p13, %p732_p4  ;;  %s762_s8 = int_to_ptr.vmem [resolvable:$true] %s166_s8 }
  0x16   : > { %s771_s10 = scalar_lea.sflag [#allocation3], %s153_s28  ;;  %s550_s11 = scalar_lea.hbm %s760_s6, 1024 }
  0x17   : > { %p551_p2 = scmp.ne.s32.totalorder %s760_s6, %s550_s11  ;;  %p552_p3 = pneg %p766_p0 }
  0x18   : > { %s555_s21 = scalar_lea.hbm %s914_s0, 2048  ;;  %p556_p4 = scmp.lt.u32.totalorder %s760_s6, %s914_s0 }
  0x19   : > { %p553_p5 = pnand %p552_p3, %p551_p2  ;;  %p557_p7 = scmp.lt.u32.totalorder %s555_s21, %s550_s11 }
  0x1a   : > { %p559_p13 = scmp.lt.u32.totalorder %s550_s11, %s760_s6 }
  0x1b   : > { %p554_p6 = pneg %p553_p5  ;;  %p558_p10 = por %p557_p7, %p556_p4 }
  0x1d   : > { %p560_p12 = por %p559_p13, %p558_p10 }
  0x1f   : > { %p561_p1 = pnand %p560_p12, %p554_p6 }
  0x21   : > { %564 = shalt.err (!%p561_p1)
}
  0x22   : > { %s565_s28 = scalar_lea.vmem %s762_s8, 1024  ;;  %s664_s29 = smov [#allocation2]  }
  0x23   : > { %p566_p2 = scmp.ne.s32.totalorder %s762_s8, %s565_s28  ;;  %s570_s30 = sshll.u32 %s664_s29, 4  ;;  %s571_s30 = int_to_ptr.vmem [resolvable:$false] %s570_s30 }
  0x24   : > { %s572_s4 = scalar_lea.vmem %s571_s30, 2048  ;;  %p573_p9 = scmp.lt.s32.totalorder %s762_s8, %s571_s30 }
  0x25   : > { %p568_p5 = pnand %p566_p2, %p552_p3  ;;  %p574_p4 = scmp.lt.s32.totalorder %s572_s4, %s565_s28 }
  0x27   : > { %p569_p11 = pneg %p568_p5  ;;  %p575_p7 = por %p574_p4, %p573_p9 }
  0x29   : > { %p576_p10 = pnand %p575_p7, %p569_p11 }
  0x2b   : > { %579 = shalt.err (!%p576_p10)
}
  0x2c   : > { %s665_s5 = smov 256   ;;  %s666_s7 = smov 16  }
  0x2d   : > { %484 = dma.hbm_to_vmem [thread:$0]  (!%p766_p0), %s760_s6, 1024, %s762_s8, %s771_s10, %s665_s5, %s665_s5, %s666_s7  }
  0x2e   : > { %p174_p12 = scmp.lt.s32.totalorder %s662_s17, 3  ;;  %p924_p1 = scmp.ge.s32.totalorder %s662_s17, 1 }
  0x30   : > { %p175_p3 = pnand %p924_p1, %p174_p12 }
  0x31   : > { %s803_s11 = sand.u32 (!%p175_p3), 1, %s646_s13  }
  0x32   : > { %178 = sbr.rel (%p175_p3) target bundleno = 218 (0xda), region = 32  ;;  %s468_s18 = sshll.u32 (!%p175_p3), %s803_s11, 6 }
  0x33   : > { %s181_s19 = scalar_lea.sflag (!%p175_p3), [#allocation3], %s803_s11  ;;  %s809_s21 = scalar_lea.vmem (!%p175_p3), [#allocation2], %s468_s18 }
  0x39   : > { %633 = dma.done.wait (%p738_p8), %s181_s19, 1024  }
  0x3a   : > { %635 = vsyncadd (%p738_p8), %s181_s19, 4294966272  ;;  %v667_v0 = vmov 0   ;;  %v279_v1 = vld [vmem:[%s915_s1 + $0x10] sm:$0xff]  ;;  %v277_v2 = vld [vmem:[%s915_s1] sm:$0xff]  ;;  %s476_s10 = sshll.u32 %s654_s15, 10  ;;  %s358_s23 = scalar_lea.sflag [#allocation4], %s803_s11 }
  0x3b   : > { %545 = vset.pattern.permute.xlu1 %v667_v0  ;;  %544 = vset.pattern.permute.xlu0 %v667_v0  ;;  %v280_v3 = vld [vmem:[%s915_s1 + $0x18] sm:$0xff]  ;;  %v278_v4 = vld [vmem:[%s915_s1 + $0x8] sm:$0xff]  ;;  %v281_v6 = vld [vmem:[%s916_s2] sm:$0xff]  ;;  %s865_s22 = scalar_lea.hbm %s917_s3, %s476_s10  ;;  %p925_p9 = scmp.ne.s32.totalorder %s921_s25, 0 }
  0x3c   : > { %297 = vperm.xlu1 %545, %v279_v1   ;;  %287 = vperm.xlu0 %544, %v277_v2   ;;  %v282_v5 = vld [vmem:[%s916_s2 + $0x8] sm:$0xff]  ;;  %v284_v7 = vld [vmem:[%s916_s2 + $0x18] sm:$0xff]  ;;  %v283_v8 = vld [vmem:[%s916_s2 + $0x10] sm:$0xff]  ;;  %s668_s28 = smov [#allocation5]  }
  0x3d   : > { %v209_v9 = vld [vmem:[%s809_s21] sm:$0xff]  ;;  %v211_v10 = vld [vmem:[%s809_s21 + $0x10] sm:$0xff]  ;;  %v210_v11 = vld [vmem:[%s809_s21 + $0x8] sm:$0xff]  ;;  %s584_s29 = sshll.u32 %s668_s28, 4  ;;  %s585_s29 = int_to_ptr.vmem [resolvable:$false] %s584_s29 }
  0x3e   : > { %v212_v12 = vld [vmem:[%s809_s21 + $0x18] sm:$0xff]  ;;  %v217_v13 = vadd.f32 %v211_v10, %v209_v9  ;;  %v213_v14 = vld [vmem:[%s809_s21 + $0x20] sm:$0xff]  ;;  %v214_v16 = vld [vmem:[%s809_s21 + $0x28] sm:$0xff]  ;;  %s586_s30 = scalar_lea.vmem %s585_s29, 2048 }
  0x3f   : > { %v226_v15 = vadd.f32 %v212_v12, %v210_v11  ;;  %v215_v18 = vld [vmem:[%s809_s21 + $0x30] sm:$0xff]  ;;  %v216_v20 = vld [vmem:[%s809_s21 + $0x38] sm:$0xff]  ;;  %s206_s21 = scalar_lea.vmem [#allocation5], %s468_s18 }
  0x40   : > { %302 = vperm.xlu1 %545, %v280_v3   ;;  %292 = vperm.xlu0 %544, %v278_v4   ;;  %v218_v17 = vadd.f32 %v217_v13, %v213_v14  ;;  %s373_s9 = sshll.u32 %s206_s21, 4  ;;  %s858_s9 = int_to_ptr.vmem [resolvable:$true] %s373_s9 }
  0x41   : > { %v227_v19 = vadd.f32 %v226_v15, %v214_v16  ;;  %s580_s24 = scalar_lea.vmem %s858_s9, 1024  ;;  %p587_p6 = scmp.lt.s32.totalorder %s858_s9, %s585_s29 }
  0x42   : > { %v219_v21 = vadd.f32 %v218_v17, %v215_v18  ;;  %p581_p8 = scmp.ne.s32.totalorder %s858_s9, %s580_s24  ;;  %p588_p13 = scmp.lt.s32.totalorder %s586_s30, %s580_s24 }
  0x43   : > { %v228_v22 = vadd.f32 %v227_v19, %v216_v20 }
  0x44   : > { %328 = vperm.xlu1 %545, %v282_v5   ;;  %323 = vperm.xlu0 %544, %v281_v6   ;;  %v220_v23 = vrot.slane %v219_v21, 4  ;;  %p582_p11 = pnand %p581_p8, %p925_p9  ;;  %p589_p2 = por %p588_p13, %p587_p6 }
  0x45   : > { %v229_v24 = vrot.slane %v228_v22, 4 }
  0x46   : > { %v221_v25 = vadd.f32 %v220_v23, %v219_v21  ;;  %p583_p0 = pneg %p582_p11 }
  0x47   : > { %v230_v26 = vadd.f32 %v229_v24, %v228_v22 }
  0x48   : > { %338 = vperm.xlu1 %545, %v284_v7   ;;  %333 = vperm.xlu0 %544, %v283_v8   ;;  %v222_v27 = vrot.slane %v221_v25, 2  ;;  %p590_p5 = pnand %p589_p2, %p583_p0 }
  0x49   : > { %v231_v28 = vrot.slane %v230_v26, 2 }
  0x4a   : > { %v223_v29 = vadd.f32 %v222_v27, %v221_v25 }
  0x4b   : > { %v232_v30 = vadd.f32 %v231_v28, %v230_v26 }
  0x4c   : > { %v224_v31 = vrot.slane %v223_v29, 1 }
  0x4d   : > { %v233_v32 = vrot.slane %v232_v30, 1 }
  0x4e   : > { %v225_v33 = vadd.f32 %v224_v31, %v223_v29 }
  0x4f   : > { %v234_v34 = vadd.f32 %v233_v32, %v232_v30 }
  0x50   : > { %v235_v35 = vmul.f32 0.03125, %v225_v33 }
  0x51   : > { %v236_v36 = vmul.f32 0.03125, %v234_v34 }
  0x52   : > { %v237_v37 = vsub.f32 %v209_v9, %v235_v35  ;;  %v239_v38 = vsub.f32 %v211_v10, %v235_v35  ;;  %v847_v41 = vsub.f32 %v213_v14, %v235_v35  ;;  %v243_v47 = vsub.f32 %v215_v18, %v235_v35 }
  0x53   : > { %v238_v39 = vsub.f32 %v210_v11, %v236_v36  ;;  %v240_v40 = vsub.f32 %v212_v12, %v236_v36  ;;  %v849_v44 = vsub.f32 %v214_v16, %v236_v36  ;;  %v244_v50 = vsub.f32 %v216_v20, %v236_v36 }
  0x54   : > { %v245_v42 = vmul.f32 %v237_v37, %v237_v37  ;;  %v247_v43 = vmul.f32 %v239_v38, %v239_v38  ;;  %v249_v48 = vmul.f32 %v847_v41, %v847_v41  ;;  %v251_v53 = vmul.f32 %v243_v47, %v243_v47 }
  0x55   : > { %v246_v45 = vmul.f32 %v238_v39, %v238_v39  ;;  %v248_v46 = vmul.f32 %v240_v40, %v240_v40  ;;  %v250_v51 = vmul.f32 %v849_v44, %v849_v44  ;;  %v252_v55 = vmul.f32 %v244_v50, %v244_v50 }
  0x56   : > { %v253_v49 = vadd.f32 %v247_v43, %v245_v42 }
  0x57   : > { %v262_v52 = vadd.f32 %v248_v46, %v246_v45 }
  0x58   : > { %v254_v54 = vadd.f32 %v253_v49, %v249_v48 }
  0x59   : > { %v263_v56 = vadd.f32 %v262_v52, %v250_v51 }
  0x5a   : > { %v255_v57 = vadd.f32 %v254_v54, %v251_v53 }
  0x5b   : > { %v264_v58 = vadd.f32 %v263_v56, %v252_v55 }
  0x5c   : > { %v256_v59 = vrot.slane %v255_v57, 4 }
  0x5d   : > { %v265_v60 = vrot.slane %v264_v58, 4 }
  0x5e   : > { %v257_v61 = vadd.f32 %v256_v59, %v255_v57 }
  0x5f   : > { %v266_v62 = vadd.f32 %v265_v60, %v264_v58 }
  0x60   : > { %v258_v63 = vrot.slane %v257_v61, 2 }
  0x61   : > { %v267_v0 = vrot.slane %v266_v62, 2 }
  0x62   : > { %v259_v1 = vadd.f32 %v258_v63, %v257_v61 }
  0x63   : > { %v268_v2 = vadd.f32 %v267_v0, %v266_v62 }
  0x64   : > { %v260_v3 = vrot.slane %v259_v1, 1 }
  0x65   : > { %v269_v4 = vrot.slane %v268_v2, 1 }
  0x66   : > { %v261_v5 = vadd.f32 %v260_v3, %v259_v1 }
  0x67   : > { %v270_v6 = vadd.f32 %v269_v4, %v268_v2 }
  0x68   : > { %v271_v7 = vmul.f32 0.03125, %v261_v5 }
  0x69   : > { %v272_v8 = vmul.f32 0.03125, %v270_v6 }
  0x6a   : > { %v273_v9 = vadd.f32 1e-05, %v271_v7 }
  0x6b   : > { %v274_v10 = vadd.f32 1e-05, %v272_v8 }
  0x6c   : > { %546 = vrsqrt.f32 %v273_v9 }
  0x6d   : > { %548 = vrsqrt.f32 %v274_v10 }
  0x76   : > { %v547_v11 = vpop.eup %546 }
  0x77   : > { %v549_v12 = vpop.eup %548 }
  0xbb   : > { %v298_v13 = vpop.permute.xlu1 %297  ;;  %v288_v14 = vpop.permute.xlu0 %287 }
  0xbc   : > { %v305_v15 = vmul.f32 %v547_v11, %v288_v14  ;;  %v306_v16 = vmul.f32 %v549_v12, %v288_v14  ;;  %v309_v21 = vmul.f32 %v547_v11, %v298_v13  ;;  %v310_v22 = vmul.f32 %v549_v12, %v298_v13 }
  0xbe   : > { %v313_v23 = vmul.f32 %v305_v15, %v237_v37  ;;  %v314_v24 = vmul.f32 %v306_v16, %v238_v39  ;;  %v317_v37 = vmul.f32 %v309_v21, %v847_v41 }
  0xbf   : > { %v303_v17 = vpop.permute.xlu1 %302  ;;  %v293_v18 = vpop.permute.xlu0 %292 }
  0xc0   : > { %v307_v19 = vmul.f32 %v547_v11, %v293_v18  ;;  %v308_v20 = vmul.f32 %v549_v12, %v293_v18  ;;  %v311_v25 = vmul.f32 %v547_v11, %v303_v17  ;;  %v312_v26 = vmul.f32 %v549_v12, %v303_v17 }
  0xc2   : > { %v315_v27 = vmul.f32 %v307_v19, %v239_v38  ;;  %v316_v28 = vmul.f32 %v308_v20, %v240_v40  ;;  %v319_v35 = vmul.f32 %v311_v25, %v243_v47  ;;  %v320_v36 = vmul.f32 %v312_v26, %v244_v50 }
  0xc3   : > { %v329_v29 = vpop.permute.xlu1 %328  ;;  %v324_v30 = vpop.permute.xlu0 %323  ;;  %v318_v38 = vmul.f32 %v310_v22, %v849_v44 }
  0xc4   : > { %v343_v31 = vadd.f32 %v329_v29, %v315_v27  ;;  %v344_v32 = vadd.f32 %v329_v29, %v316_v28  ;;  %v341_v33 = vadd.f32 %v324_v30, %v313_v23  ;;  %v342_v34 = vadd.f32 %v324_v30, %v314_v24 }
  0xc6   : > { %351 = vst [vmem:[%s206_s21 + $0x10] sm:$0xff] %v343_v31  ;;  %352 = vst [vmem:[%s206_s21 + $0x18] sm:$0xff] %v344_v32 }
  0xc7   : > { %349 = vst [vmem:[%s206_s21] sm:$0xff] %v341_v33  ;;  %350 = vst [vmem:[%s206_s21 + $0x8] sm:$0xff] %v342_v34  ;;  %v339_v39 = vpop.permute.xlu1 %338  ;;  %v334_v40 = vpop.permute.xlu0 %333 }
  0xc8   : > { %v347_v42 = vadd.f32 %v339_v39, %v319_v35  ;;  %v348_v43 = vadd.f32 %v339_v39, %v320_v36  ;;  %v345_v45 = vadd.f32 %v334_v40, %v317_v37  ;;  %v346_v46 = vadd.f32 %v334_v40, %v318_v38 }
  0xca   : > { %355 = vst [vmem:[%s206_s21 + $0x30] sm:$0xff] %v347_v42  ;;  %356 = vst [vmem:[%s206_s21 + $0x38] sm:$0xff] %v348_v43 }
  0xcb   : > { %353 = vst [vmem:[%s206_s21 + $0x20] sm:$0xff] %v345_v45  ;;  %354 = vst [vmem:[%s206_s21 + $0x28] sm:$0xff] %v346_v46 }
  0xcc   : > { %593 = shalt.err (!%p590_p5)
}
  0xcd   : > { %s594_s4 = scalar_lea.hbm %s865_s22, 1024  ;;  %s598_s19 = scalar_lea.hbm %s917_s3, 2048 }
  0xce   : > { %p595_p4 = scmp.ne.s32.totalorder %s865_s22, %s594_s4  ;;  %p599_p12 = scmp.lt.u32.totalorder %s865_s22, %s917_s3 }
  0xcf   : > { %p600_p1 = scmp.lt.u32.totalorder %s598_s19, %s594_s4  ;;  %p602_p8 = scmp.lt.u32.totalorder %s594_s4, %s865_s22 }
  0xd0   : > { %p596_p7 = pnand %p595_p4, %p925_p9 }
  0xd1   : > { %p601_p3 = por %p600_p1, %p599_p12 }
  0xd2   : > { %p597_p10 = pneg %p596_p7 }
  0xd3   : > { %p603_p11 = por %p602_p8, %p601_p3 }
  0xd5   : > { %p604_p0 = pnand %p603_p11, %p597_p10 }
  0xd7   : > { %607 = shalt.err (!%p604_p0)
}
  0xd8   : > { %s669_s21 = smov 256   ;;  %s670_s10 = smov 16  }
  0xd9   : > { %479 = dma.vmem_to_hbm [thread:$0]  (%p925_p9), %s858_s9, 1024, %s865_s22, %s358_s23, %s669_s21, %s669_s21, %s670_s10  }
  0xda PF: > { %s388_s18 = sand.u32 1, %s642_s12   ;;  %p926_p6 = scmp.ne.s32.totalorder %s922_s27, 0 }
  0xdb   : > { %p927_p13 = scmp.ge.s32.totalorder %s662_s17, 2  ;;  %s389_s15 = scalar_lea.sflag [#allocation4], %s388_s18 }
  0xdd   : > { %p486_p2 = pnand %p927_p13, %p926_p6 }
  0xdf   : > { %637 = dma.done.wait (!%p486_p2), %s389_s15, 1024  }
  0xe0   : > { %639 = vsyncadd (!%p486_p2), %s389_s15, 4294966272  ;;  %s19_s17 = sadd.s32 1, %s662_s17   ;;  %s928_s12 = smov %s646_s13 }
  0xe1   : > { %p16_p5 = scmp.ge.s32.totalorder %s19_s17, 4   ;;  %s929_s13 = smov %s650_s14 }
  0xe2   : > { %s930_s14 = smov %s747_s26  ;;  %s931_s15 = smov %s658_s16 }
  0xe3   : > { %s932_s16 = smov %s934_s20  ;;  %18 = sbr.rel (!%p16_p5) target bundleno = 6 (0x6), region = 77 }
  0xea   :  { %394 = vsyncpa [#allocation3], 1 }
  0xeb   :  { %396 = vsyncpa [#allocation3 + $0x1], 1 }
  0xec   :  { %397 = vsyncpa [#allocation4], 1 }
  0xed   :  { %399 = vsyncpa [#allocation4 + $0x1], 1 }

</bundles_post_ra>
